<compile_context>
chip_gen: v6e
topology: v6e:2x2x1
jax: 0.10.0
libtpu: 0.0.40
codegen_flags: <defaults>
</compile_context>

<pallas_src>
import functools

import jax
import jax.numpy as jnp
from jax.experimental import pallas as pl
from jax.experimental.pallas import tpu as pltpu


def _round_up(x, m):
    return (x + m - 1) // m * m


def _vmem_capacity():
    """Physical VMEM bytes per core (falls back to the v7x value, 64 MiB)."""
    try:
        info = pltpu.get_tpu_info()
        cap = int(getattr(info, "vmem_capacity_bytes", 0) or 0)
        if cap > 0:
            return cap
    except Exception:
        pass
    return 64 << 20


def _vmem_ceiling(vmem_cap):
    # Never ask Mosaic for more than it can realistically grant: on v7x
    # (64 MiB physical) cap at 28 MiB, on v5e/v6e (128 MiB) at 48 MiB.
    if vmem_cap <= (64 << 20):
        return 28 << 20
    return 48 << 20


def _vmem_limit(need_bytes, vmem_cap):
    return int(min(max(need_bytes + (1 << 20), 8 << 20), _vmem_ceiling(vmem_cap)))


def _pick_tile(n_p, vmem_cap):
    """Row/source tile: large for DMA efficiency, but keep >= 2 row tiles so
    the 'parallel' row axis can shard across both v7x TensorCores."""
    if vmem_cap > (96 << 20):
        cands = (1024, 512, 384, 256, 128)   # v5e/v6e: bigger tiles are free
    else:
        cands = (512, 384, 256, 128)         # v7x: keep VMEM headroom
    for t in cands:
        if n_p % t == 0 and n_p // t >= 2:
            return t
    return 128 if n_p % 128 == 0 else n_p


# ------------------------------ Pallas kernels -------------------------------
def _project_kernel(x_ref, w_ref, o_ref, acc_ref):
    # XP[i_blk] = sum_kf X[i_blk, kf_blk] @ W[kf_blk]   (f32 acc, bf16 out)
    kf = pl.program_id(1)

    @pl.when(kf == 0)
    def _():
        acc_ref[...] = jnp.zeros_like(acc_ref)

    acc_ref[...] += jnp.dot(x_ref[...], w_ref[...],
                            preferred_element_type=jnp.float32)

    @pl.when(kf == pl.num_programs(1) - 1)
    def _():
        o_ref[...] = acc_ref[...].astype(o_ref.dtype)


def _agg_fused_kernel(a_ref, xp_ref, b1_ref, w2_ref, o_ref, acc_ref, *,
                      tk, xp_resident):
    # H2[i_blk] = relu(sum_k A[i_blk,k] @ XP[k] + b1) @ W2   (layer-2 proj fused)
    k = pl.program_id(1)

    @pl.when(k == 0)
    def _():
        acc_ref[...] = jnp.zeros_like(acc_ref)

    if xp_resident:
        off = pl.multiple_of(k * tk, tk)
        xp_blk = xp_ref[pl.ds(off, tk), :]
    else:
        xp_blk = xp_ref[...]
    acc_ref[...] += jnp.dot(a_ref[...], xp_blk,
                            preferred_element_type=jnp.float32)

    @pl.when(k == pl.num_programs(1) - 1)
    def _():
        h = jnp.maximum(acc_ref[...] + b1_ref[...], 0.0)
        o_ref[...] = jnp.dot(h.astype(w2_ref.dtype), w2_ref[...],
                             preferred_element_type=jnp.float32
                             ).astype(o_ref.dtype)


def _agg_final_kernel(a_ref, h_ref, b2_ref, o_ref, *, tk, h_resident):
    # OUT[i_blk] = sum_k A[i_blk,k] @ H2[k] + b2   (accumulate into f32 output)
    k = pl.program_id(1)

    @pl.when(k == 0)
    def _():
        o_ref[...] = jnp.zeros_like(o_ref)

    if h_resident:
        off = pl.multiple_of(k * tk, tk)
        h_blk = h_ref[pl.ds(off, tk), :]
    else:
        h_blk = h_ref[...]
    o_ref[...] += jnp.dot(a_ref[...], h_blk,
                          preferred_element_type=jnp.float32)

    @pl.when(k == pl.num_programs(1) - 1)
    def _():
        o_ref[...] += b2_ref[...]


# ------------------------------- pallas_call wrappers -------------------------
def _project(x, w, *, tm, vmem_cap):
    n_p, fin_p = x.shape
    fout_p = w.shape[1]
    if fin_p <= 512:
        tkf = fin_p
    else:
        tkf = next(t for t in (512, 384, 256, 128) if fin_p % t == 0)
    need = (2 * tm * tkf * 2 + 2 * tkf * fout_p * 2
            + 2 * tm * fout_p * 2 + tm * fout_p * 4)
    return pl.pallas_call(
        _project_kernel,
        out_shape=jax.ShapeDtypeStruct((n_p, fout_p), jnp.bfloat16),
        grid_spec=pltpu.PrefetchScalarGridSpec(
            num_scalar_prefetch=0,
            grid=(n_p // tm, fin_p // tkf),
            in_specs=[pl.BlockSpec((tm, tkf), lambda i, kf: (i, kf)),
                      pl.BlockSpec((tkf, fout_p), lambda i, kf: (kf, 0))],
            out_specs=pl.BlockSpec((tm, fout_p), lambda i, kf: (i, 0)),
            scratch_shapes=[pltpu.VMEM((tm, fout_p), jnp.float32)]),
        compiler_params=pltpu.CompilerParams(
            dimension_semantics=("parallel", "arbitrary"),
            vmem_limit_bytes=_vmem_limit(need, vmem_cap)),
        cost_estimate=pl.CostEstimate(
            flops=2 * n_p * fin_p * fout_p,
            transcendentals=0,
            bytes_accessed=2 * (n_p * fin_p + fin_p * fout_p + n_p * fout_p)),
    )(x, w)


def _aggregate_fused(adj, xp, b1, w2, *, tm, tk, vmem_cap):
    n_p = adj.shape[0]
    hid_p = xp.shape[1]
    out_p = w2.shape[1]
    fixed = (2 * tm * tk * 2          # A tile (bf16, double-buffered)
             + 2 * hid_p * 4          # b1
             + 2 * hid_p * out_p * 2  # W2
             + 2 * tm * out_p * 2     # output tile
             + tm * hid_p * 4)        # f32 accumulator
    resident = 2 * n_p * hid_p * 2
    streamed = 2 * tk * hid_p * 2
    xp_resident = fixed + resident + (2 << 20) <= _vmem_ceiling(vmem_cap)
    need = fixed + (resident if xp_resident else streamed)

    if xp_resident:
        xp_spec = pl.BlockSpec((n_p, hid_p), lambda i, k: (0, 0))
    else:
        xp_spec = pl.BlockSpec((tk, hid_p), lambda i, k: (k, 0))

    kernel = functools.partial(_agg_fused_kernel, tk=tk, xp_resident=xp_resident)
    return pl.pallas_call(
        kernel,
        out_shape=jax.ShapeDtypeStruct((n_p, out_p), jnp.bfloat16),
        grid_spec=pltpu.PrefetchScalarGridSpec(
            num_scalar_prefetch=0,
            grid=(n_p // tm, n_p // tk),
            in_specs=[pl.BlockSpec((tm, tk), lambda i, k: (i, k)),
                      xp_spec,
                      pl.BlockSpec((1, hid_p), lambda i, k: (0, 0)),
                      pl.BlockSpec((hid_p, out_p), lambda i, k: (0, 0))],
            out_specs=pl.BlockSpec((tm, out_p), lambda i, k: (i, 0)),
            scratch_shapes=[pltpu.VMEM((tm, hid_p), jnp.float32)]),
        compiler_params=pltpu.CompilerParams(
            dimension_semantics=("parallel", "arbitrary"),
            vmem_limit_bytes=_vmem_limit(need, vmem_cap)),
        cost_estimate=pl.CostEstimate(
            flops=2 * n_p * n_p * hid_p + 2 * n_p * hid_p * out_p,
            transcendentals=0,
            bytes_accessed=(2 * n_p * n_p + 2 * n_p * hid_p
                            + 2 * hid_p * out_p + 2 * n_p * out_p
                            + 4 * hid_p)),
    )(adj, xp, b1, w2)


def _aggregate_final(adj, h, b2, *, tm, tk, vmem_cap):
    n_p = adj.shape[0]
    out_p = h.shape[1]
    fixed = (2 * tm * tk * 2          # A tile
             + 2 * out_p * 4          # b2
             + 2 * tm * out_p * 4)    # f32 output tile (doubles as accumulator)
    resident = 2 * n_p * out_p * 2
    streamed = 2 * tk * out_p * 2
    h_resident = fixed + resident + (2 << 20) <= _vmem_ceiling(vmem_cap)
    need = fixed + (resident if h_resident else streamed)

    if h_resident:
        h_spec = pl.BlockSpec((n_p, out_p), lambda i, k: (0, 0))
    else:
        h_spec = pl.BlockSpec((tk, out_p), lambda i, k: (k, 0))

    kernel = functools.partial(_agg_final_kernel, tk=tk, h_resident=h_resident)
    return pl.pallas_call(
        kernel,
        out_shape=jax.ShapeDtypeStruct((n_p, out_p), jnp.float32),
        grid_spec=pltpu.PrefetchScalarGridSpec(
            num_scalar_prefetch=0,
            grid=(n_p // tm, n_p // tk),
            in_specs=[pl.BlockSpec((tm, tk), lambda i, k: (i, k)),
                      h_spec,
                      pl.BlockSpec((1, out_p), lambda i, k: (0, 0))],
            out_specs=pl.BlockSpec((tm, out_p), lambda i, k: (i, 0))),
        compiler_params=pltpu.CompilerParams(
            dimension_semantics=("parallel", "arbitrary"),
            vmem_limit_bytes=_vmem_limit(need, vmem_cap)),
        cost_estimate=pl.CostEstimate(
            flops=2 * n_p * n_p * out_p,
            transcendentals=0,
            bytes_accessed=(2 * n_p * n_p + 2 * n_p * out_p
                            + 4 * n_p * out_p + 4 * out_p)),
    )(adj, h, b2)


# ------------------------ graph preprocessing (plain JAX) ---------------------
# TODO(synk): the edge_index -> dense adjacency scatter and degree rsqrt have
# no clean Pallas scatter equivalent on TPU; they run once in plain JAX (and
# should be cached by the caller when the graph is static).  Duplicate edges
# are collapsed by .at[].set (PyG counts multiplicities on multigraphs).
# TODO(synk): for production-scale sparse graphs, replace the dense N^2
# adjacency with a scalar-prefetch neighbor-gather aggregation (traffic ~O(E)).
def normalized_adjacency(edge_index, num_nodes, num_padded, dtype=jnp.bfloat16):
    """D^{-1/2}(A+I)D^{-1/2} with A[dst, src]=1, built directly at padded size."""
    src, dst = edge_index[0], edge_index[1]
    a = jnp.zeros((num_padded, num_padded), jnp.float32).at[dst, src].set(1.0)
    idx = jnp.arange(num_padded)
    valid = (idx < num_nodes).astype(jnp.float32)
    diag = (idx[:, None] == idx[None, :]).astype(jnp.float32) * valid[:, None]
    a_hat = a * (1.0 - diag) + diag               # exactly one self loop per real node
    deg = jnp.sum(a_hat, axis=1)                  # >= 1 for real nodes, 0 for padding
    dinv = jnp.where(deg > 0,
                     jax.lax.rsqrt(jnp.maximum(deg, 1e-12)),
                     jnp.zeros_like(deg))
    return (a_hat * dinv[:, None] * dinv[None, :]).astype(dtype)


# ------------------------------ model / forward -------------------------------
def glorot(key, shape):
    fan_in, fan_out = shape
    bound = (6.0 / (fan_in + fan_out)) ** 0.5
    return jax.random.uniform(key, shape, jnp.float32, -bound, bound)


def init_gcn_params(key, in_features, hidden_features, out_features):
    k1, k2 = jax.random.split(key)
    return {
        "w1": glorot(k1, (in_features, hidden_features)),
        "b1": jnp.zeros((hidden_features,), jnp.float32),
        "w2": glorot(k2, (hidden_features, out_features)),
        "b2": jnp.zeros((out_features,), jnp.float32),
    }


def gcn_forward(params, x, edge_index, *, hidden_features, out_features):
    n, fin = x.shape
    vmem_cap = _vmem_capacity()
    n_p = _round_up(n, 128)
    tile = _pick_tile(n_p, vmem_cap)
    fin_p = _round_up(fin, 128)
    hid_p = _round_up(hidden_features, 128)
    out_p = _round_up(out_features, 128)

    adj = normalized_adjacency(edge_index, n, n_p)          # bf16, padded

    x_p = jnp.zeros((n_p, fin_p), jnp.bfloat16).at[
        :n, :fin].set(x.astype(jnp.bfloat16))
    w1_p = jnp.zeros((fin_p, hid_p), jnp.bfloat16).at[
        :fin, :hidden_features].set(params["w1"].astype(jnp.bfloat16))
    b1_p = jnp.zeros((1, hid_p), jnp.float32).at[
        0, :hidden_features].set(params["b1"])
    w2_p = jnp.zeros((hid_p, out_p), jnp.bfloat16).at[
        :hidden_features, :out_features].set(params["w2"].astype(jnp.bfloat16))
    b2_p = jnp.zeros((1, out_p), jnp.float32).at[
        0, :out_features].set(params["b2"])

    # layer 1 projection:     XP1 = X @ W1
    xp1 = _project(x_p, w1_p, tm=tile, vmem_cap=vmem_cap)
    # layer 1 agg + layer 2 proj (fused):  H2 = relu(A @ XP1 + b1) @ W2
    h2 = _aggregate_fused(adj, xp1, b1_p, w2_p, tm=tile, tk=tile,
                          vmem_cap=vmem_cap)
    # layer 2 aggregation:    OUT = A @ H2 + b2
    out = _aggregate_final(adj, h2, b2_p, tm=tile, tk=tile, vmem_cap=vmem_cap)
    return out[:n, :out_features]


# -------------- pure-JAX reference (same dense math, no Pallas) ---------------
def _gcn_ref(params, x, adj):
    h = adj @ (x @ params["w1"]) + params["b1"]
    h = jnp.maximum(h, 0.0)
    return adj @ (h @ params["w2"]) + params["b2"]


if __name__ == "__main__":
    N, IN_F, HID_F, OUT_F = 16, 8, 32, 8

    key = jax.random.PRNGKey(0)
    k_x, k_e, k_p = jax.random.split(key, 3)

    x = jax.random.normal(k_x, (N, IN_F), jnp.float32)
    num_edges = 40
    edge_index = jax.random.randint(k_e, (2, num_edges), 0, N)   # [2, E] (src, dst)

    params = init_gcn_params(k_p, IN_F, HID_F, OUT_F)

    out = gcn_forward(params, x, edge_index,
                      hidden_features=HID_F, out_features=OUT_F)
    out = jax.block_until_ready(out)
    assert out.shape == (N, OUT_F), out.shape

    # sanity check against the pure-JAX f32 reference (bf16 storage -> looser tol)
    adj_f32 = normalized_adjacency(edge_index, N, N, dtype=jnp.float32)
    ref = _gcn_ref(params, x, adj_f32)
    max_err = float(jnp.max(jnp.abs(out - ref)))
    assert jnp.allclose(out, ref, atol=3e-2, rtol=3e-2), max_err

    print("KERNEL_OK")
</pallas_src>

<mosaic_0001>
module attributes {stable_mosaic.version = 11 : i64} {
  func.func @_project_kernel(%arg0: i32, %arg1: i32, %arg2: memref<128x128xbf16, #tpu.memory_space<vmem>>, %arg3: memref<128x128xbf16, #tpu.memory_space<vmem>>, %arg4: memref<128x128xbf16, #tpu.memory_space<vmem>>, %arg5: memref<128x128xf32, #tpu.memory_space<vmem>>) attributes {dimension_semantics = [#tpu.dimension_semantics<parallel>, #tpu.dimension_semantics<arbitrary>], iteration_bounds = array<i64: 1, 1>, scalar_prefetch = 0 : i64, scratch_operands = 1 : i64, tpu.core_type = #tpu.core_type<tc>, window_params = [{transform_indices = @transform_0, window_bounds = array<i64: 128, 128>}, {transform_indices = @transform_1, window_bounds = array<i64: 128, 128>}, {transform_indices = @transform_2, window_bounds = array<i64: 128, 128>}]} {
    %c0_i32 = arith.constant 0 : i32
    %0 = arith.cmpi eq, %arg1, %c0_i32 : i32
    %1 = arith.extui %0 : i1 to i32
    %c0_i32_0 = arith.constant 0 : i32
    %2 = arith.cmpi ne, %1, %c0_i32_0 : i32
    scf.if %2 {
      %cst_10 = arith.constant 0.000000e+00 : f32
      %12 = vector.broadcast %cst_10 : f32 to vector<128x128xf32>
      %c0_11 = arith.constant 0 : index
      %c0_12 = arith.constant 0 : index
      %13 = vector.load %arg5[%c0_11, %c0_12] : memref<128x128xf32, #tpu.memory_space<vmem>>, vector<128x128xf32>
      tpu.vector_store %arg5[%c0_11, %c0_12], %12 {strides = array<i32>} : memref<128x128xf32, #tpu.memory_space<vmem>>, vector<128x128xf32>,
    } else {
    }
    %c0 = arith.constant 0 : index
    %c0_1 = arith.constant 0 : index
    %3 = vector.load %arg5[%c0, %c0_1] : memref<128x128xf32, #tpu.memory_space<vmem>>, vector<128x128xf32>
    %c0_2 = arith.constant 0 : index
    %c0_3 = arith.constant 0 : index
    %4 = vector.load %arg2[%c0_2, %c0_3] : memref<128x128xbf16, #tpu.memory_space<vmem>>, vector<128x128xbf16>
    %c0_4 = arith.constant 0 : index
    %c0_5 = arith.constant 0 : index
    %5 = vector.load %arg3[%c0_4, %c0_5] : memref<128x128xbf16, #tpu.memory_space<vmem>>, vector<128x128xbf16>
    %cst = arith.constant dense<0.000000e+00> : vector<128x128xf32>
    %6 = tpu.matmul %4, %5, %cst {dimension_numbers = #tpu.dot_dimension_numbers<[1], [0], [0], [1], [0, 0, 1, 1], [], []>} : vector<128x128xbf16>, vector<128x128xbf16>, vector<128x128xf32> -> vector<128x128xf32>
    %7 = arith.addf %3, %6 : vector<128x128xf32>
    %c0_6 = arith.constant 0 : index
    %c0_7 = arith.constant 0 : index
    %8 = vector.load %arg5[%c0_6, %c0_7] : memref<128x128xf32, #tpu.memory_space<vmem>>, vector<128x128xf32>
    tpu.vector_store %arg5[%c0_6, %c0_7], %7 {strides = array<i32>} : memref<128x128xf32, #tpu.memory_space<vmem>>, vector<128x128xf32>,
    %c0_i32_8 = arith.constant 0 : i32
    %9 = arith.cmpi eq, %arg1, %c0_i32_8 : i32
    %10 = arith.extui %9 : i1 to i32
    %c0_i32_9 = arith.constant 0 : i32
    %11 = arith.cmpi ne, %10, %c0_i32_9 : i32
    scf.if %11 {
      %c0_10 = arith.constant 0 : index
      %c0_11 = arith.constant 0 : index
      %12 = vector.load %arg5[%c0_10, %c0_11] : memref<128x128xf32, #tpu.memory_space<vmem>>, vector<128x128xf32>
      %13 = arith.truncf %12 : vector<128x128xf32> to vector<128x128xbf16>
      %c0_12 = arith.constant 0 : index
      %c0_13 = arith.constant 0 : index
      %14 = vector.load %arg4[%c0_12, %c0_13] : memref<128x128xbf16, #tpu.memory_space<vmem>>, vector<128x128xbf16>
      tpu.vector_store %arg4[%c0_12, %c0_13], %13 {strides = array<i32>} : memref<128x128xbf16, #tpu.memory_space<vmem>>, vector<128x128xbf16>,
    } else {
    }
    return
  }
  func.func @transform_0(%arg0: i32, %arg1: i32) -> (i32, i32) {
    %c0_i32 = arith.constant 0 : i32
    return %arg0, %arg1 : i32, i32
  }
  func.func @transform_1(%arg0: i32, %arg1: i32) -> (i32, i32) {
    %c0_i32 = arith.constant 0 : i32
    %c0_i32_0 = arith.constant 0 : i32
    return %arg1, %c0_i32 : i32, i32
  }
  func.func @transform_2(%arg0: i32, %arg1: i32) -> (i32, i32) {
    %c0_i32 = arith.constant 0 : i32
    %c0_i32_0 = arith.constant 0 : i32
    return %arg0, %c0_i32 : i32, i32
  }
}

</mosaic_0001>

<bundles_post_ra>
// kernel: tpu_custom_call.1
= control target key start
LH: loop header
LB: loop body
LE: loop exit
PB: predicated region body
PF: predicated region fallthrough
CT: control target
= control target key end

     0   :  { %7 = vsyncpa [#allocation4], 0  ;;  %s735_s0 = inlined_call_operand.hbm [shape: bf16[128,128], index: 0, kind: input, shape index: {}]   ;;  %s736_s1 = inlined_call_operand.hbm [shape: bf16[128,128], index: 1, kind: input, shape index: {}]   ;;  %s737_s2 = inlined_call_operand.hbm [shape: bf16[128,128], index: 2, kind: output, shape index: {}]  }
   0x1   :  { %8 = vsyncpa [#allocation7], 0 }
   0x2   :  { %9 = vsyncpa [#allocation5], 0  ;;  %s697_s9 = smov [#allocation3]  }
   0x3   :  { %s15_s10 = sshll.u32 %s697_s9, 4  ;;  %s16_s10 = int_to_ptr.vmem [resolvable:$true] %s15_s10 }
   0x4   :  { %s639_s11 = scalar_lea.vmem %s16_s10, 1024  ;;  %p644_p1 = scmp.lt.s32.totalorder %s16_s10, %s16_s10 }
   0x5   :  { %p640_p0 = scmp.ne.s32.totalorder %s16_s10, %s639_s11  ;;  %p645_p2 = scmp.lt.s32.totalorder %s639_s11, %s639_s11 }
   0x7   :  { %p646_p3 = por %p645_p2, %p644_p1 }
   0x9   :  { %p647_p4 = pnand %p646_p3, %p640_p0 }
   0xb   :  { %650 = shalt.err (!%p647_p4)
}
   0xc   :  { %s698_s12 = smov 64   ;;  %s699_s13 = smov 4  }
   0xd   :  { %21 = dma.hbm_to_vmem [thread:$0]  %s735_s0, 1024, %s16_s10, [#allocation4], %s698_s12, %s698_s12, %s699_s13  }
   0xe   :  { %s700_s16 = smov [#allocation6]  }
   0xf   :  { %s27_s17 = sshll.u32 %s700_s16, 4  ;;  %s28_s17 = int_to_ptr.vmem [resolvable:$true] %s27_s17 }
  0x10   :  { %s659_s18 = scalar_lea.vmem %s28_s17, 1024  ;;  %p664_p6 = scmp.lt.s32.totalorder %s28_s17, %s28_s17 }
  0x11   :  { %p660_p5 = scmp.ne.s32.totalorder %s28_s17, %s659_s18  ;;  %p665_p7 = scmp.lt.s32.totalorder %s659_s18, %s659_s18 }
  0x13   :  { %p666_p8 = por %p665_p7, %p664_p6 }
  0x15   :  { %p667_p9 = pnand %p666_p8, %p660_p5 }
  0x17   :  { %670 = shalt.err (!%p667_p9)
}
  0x18   :  { %33 = dma.hbm_to_vmem [thread:$0]  %s736_s1, 1024, %s28_s17, [#allocation7], %s698_s12, %s698_s12, %s699_s13  }
  0x19   :  { %691 = dma.done.wait [#allocation4], 1024  }
  0x1a   :  { %692 = vsyncadd [#allocation4], 4294966272 }
  0x1b   :  { %693 = dma.done.wait [#allocation7], 1024  }
  0x1c   :  { %694 = vsyncadd [#allocation7], 4294966272  ;;  %v615_v0 = vld [vmem:[#allocation6 + $0x38] sm:$0xff]   ;;  %v616_v1 = vld [vmem:[#allocation6 + $0x30] sm:$0xff]   ;;  %s701_s0 = smov [#allocation8]  }
  0x1d   :  { %562 = vmatprep.subr.bf16.mxu0 %v615_v0  ;;  %594 = vmatprep.subr.bf16.mxu1 %v615_v0  ;;  %v617_v2 = vld [vmem:[#allocation6 + $0x28] sm:$0xff]   ;;  %v618_v3 = vld [vmem:[#allocation6 + $0x20] sm:$0xff]   ;;  %v619_v6 = vld [vmem:[#allocation6 + $0x18] sm:$0xff]   ;;  %s438_s1 = sshll.u32 %s701_s0, 4  ;;  %s439_s1 = int_to_ptr.vmem [resolvable:$true] %s438_s1 }
  0x1e   :  { %563 = vmatpush3.bf16.msra.mxu0 %v615_v0  ;;  %602 = vmatpush3.bf16.msra.mxu1 %v615_v0  ;;  %v623_v4 = vld [vmem:[#allocation3] sm:$0xff]   ;;  %v620_v7 = vld [vmem:[#allocation6 + $0x10] sm:$0xff]   ;;  %v621_v8 = vld [vmem:[#allocation6 + $0x8] sm:$0xff]   ;;  %s671_s21 = scalar_lea.vmem %s439_s1, 1024  ;;  %p676_p11 = scmp.lt.s32.totalorder %s439_s1, %s439_s1 }
  0x1f   :  { %564 = vmatprep.subr.bf16.mxu0 %v616_v1  ;;  %595 = vmatprep.subr.bf16.mxu1 %v616_v1  ;;  %v624_v5 = vld [vmem:[#allocation3 + $0x20] sm:$0xff]   ;;  %v625_v10 = vld [vmem:[#allocation3 + $0x8] sm:$0xff]   ;;  %v627_v12 = vld [vmem:[#allocation3 + $0x10] sm:$0xff]   ;;  %p672_p10 = scmp.ne.s32.totalorder %s439_s1, %s671_s21  ;;  %p677_p12 = scmp.lt.s32.totalorder %s671_s21, %s671_s21 }
  0x20   :  { %578 = vmatprep.mubr.bf16.mxu0 %v623_v4  ;;  %586 = vmatprep.mubr.bf16.mxu1 %v624_v5  ;;  %v622_v9 = vld [vmem:[#allocation6] sm:$0xff]   ;;  %v626_v11 = vld [vmem:[#allocation3 + $0x28] sm:$0xff]   ;;  %v628_v13 = vld [vmem:[#allocation3 + $0x30] sm:$0xff]  }
  0x21   :  { %v629_v14 = vld [vmem:[#allocation3 + $0x18] sm:$0xff]   ;;  %p678_p13 = por %p677_p12, %p676_p11 }
  0x22   :  { %565 = vmatpush3.bf16.msra.mxu0 %v616_v1  ;;  %603 = vmatpush3.bf16.msra.mxu1 %v616_v1  ;;  %v630_v15 = vld [vmem:[#allocation3 + $0x38] sm:$0xff]  }
  0x23   :  { %566 = vmatprep.subr.bf16.mxu0 %v617_v2  ;;  %596 = vmatprep.subr.bf16.mxu1 %v617_v2  ;;  %p679_p0 = pnand %p678_p13, %p672_p10 }
  0x26   :  { %567 = vmatpush3.bf16.msra.mxu0 %v617_v2  ;;  %604 = vmatpush3.bf16.msra.mxu1 %v617_v2 }
  0x27   :  { %568 = vmatprep.subr.bf16.mxu0 %v618_v3  ;;  %597 = vmatprep.subr.bf16.mxu1 %v618_v3 }
  0x2a   :  { %569 = vmatpush3.bf16.msra.mxu0 %v618_v3  ;;  %605 = vmatpush3.bf16.msra.mxu1 %v618_v3 }
  0x2b   :  { %570 = vmatprep.subr.bf16.mxu0 %v619_v6  ;;  %598 = vmatprep.subr.bf16.mxu1 %v619_v6 }
  0x2e   :  { %571 = vmatpush3.bf16.msra.mxu0 %v619_v6  ;;  %606 = vmatpush3.bf16.msra.mxu1 %v619_v6 }
  0x2f   :  { %572 = vmatprep.subr.bf16.mxu0 %v620_v7  ;;  %599 = vmatprep.subr.bf16.mxu1 %v620_v7 }
  0x32   :  { %573 = vmatpush3.bf16.msra.mxu0 %v620_v7  ;;  %607 = vmatpush3.bf16.msra.mxu1 %v620_v7 }
  0x33   :  { %574 = vmatprep.subr.bf16.mxu0 %v621_v8  ;;  %600 = vmatprep.subr.bf16.mxu1 %v621_v8 }
  0x36   :  { %575 = vmatpush3.bf16.msra.mxu0 %v621_v8  ;;  %608 = vmatpush3.bf16.msra.mxu1 %v621_v8 }
  0x37   :  { %576 = vmatprep.subr.bf16.mxu0 %v622_v9  ;;  %601 = vmatprep.subr.bf16.mxu1 %v622_v9 }
  0x3a   :  { %577 = vmatpush3.bf16.msra.mxu0 %v622_v9  ;;  %609 = vmatpush3.bf16.msra.mxu1 %v622_v9 }
  0x3d   :  { %579 = vmatmul.mubr.bf16.vlgmr.msra.gmra.mxu0 %v625_v10  ;;  %587 = vmatmul.mubr.bf16.vlgmr.msra.gmra.mxu1 %v626_v11 }
  0x3e   :  { %582 = vmatprep.mubr.bf16.mxu0 %v627_v12  ;;  %590 = vmatprep.mubr.bf16.mxu1 %v628_v13 }
  0x45   :  { %583 = vmatmul.mubr.bf16.gmra.mxu0 %v629_v14  ;;  %591 = vmatmul.mubr.bf16.gmra.mxu1 %v630_v15 }
  0xfd   :  { %v580_v16 = vpop.f32.mrf.mxu0  ;;  %v588_v17 = vpop.f32.mrf.mxu1 }
  0xff   :  { %v239_v18 = vpop.f32.mrf.mxu0  ;;  %v271_v19 = vpop.f32.mrf.mxu1 }
 0x101   :  { %v581_v20 = vpop.f32.mrf.mxu0  ;;  %v589_v21 = vpop.f32.mrf.mxu1 }
 0x102   :  { %v507_v22 = vpack.c.bf16 %v581_v20, %v580_v16  ;;  %v527_v23 = vpack.c.bf16 %v589_v21, %v588_v17 }
 0x103   :  { %v242_v24 = vpop.f32.mrf.mxu0  ;;  %v274_v25 = vpop.f32.mrf.mxu1 }
 0x104   :  { %539 = vst [vmem:[#allocation8 + $0x8] sm:$0xff] %v507_v22   ;;  %543 = vst [vmem:[#allocation8 + $0x28] sm:$0xff] %v527_v23   ;;  %v502_v26 = vpack.c.bf16 %v242_v24, %v239_v18  ;;  %v522_v27 = vpack.c.bf16 %v274_v25, %v271_v19 }
 0x105   :  { %v584_v28 = vpop.f32.mrf.mxu0  ;;  %v592_v29 = vpop.f32.mrf.mxu1 }
 0x106   :  { %503 = vst [vmem:[#allocation8] sm:$0xff] %v502_v26   ;;  %542 = vst [vmem:[#allocation8 + $0x20] sm:$0xff] %v522_v27  }
 0x107   :  { %v255_v30 = vpop.f32.mrf.mxu0  ;;  %v287_v31 = vpop.f32.mrf.mxu1 }
 0x109   :  { %v585_v32 = vpop.f32.mrf.mxu0  ;;  %v593_v33 = vpop.f32.mrf.mxu1 }
 0x10a   :  { %v517_v34 = vpack.c.bf16 %v585_v32, %v584_v28  ;;  %v537_v35 = vpack.c.bf16 %v593_v33, %v592_v29 }
 0x10b   :  { %v258_v36 = vpop.f32.mrf.mxu0  ;;  %v290_v37 = vpop.f32.mrf.mxu1 }
 0x10c   :  { %541 = vst [vmem:[#allocation8 + $0x18] sm:$0xff] %v517_v34   ;;  %545 = vst [vmem:[#allocation8 + $0x38] sm:$0xff] %v537_v35   ;;  %v512_v38 = vpack.c.bf16 %v258_v36, %v255_v30  ;;  %v532_v39 = vpack.c.bf16 %v290_v37, %v287_v31 }
 0x10e   :  { %540 = vst [vmem:[#allocation8 + $0x10] sm:$0xff] %v512_v38   ;;  %544 = vst [vmem:[#allocation8 + $0x30] sm:$0xff] %v532_v39  }
 0x10f   :  { %682 = shalt.err (!%p679_p0)
}
 0x110   :  { %444 = dma.vmem_to_hbm [thread:$0]  %s439_s1, 1024, %s737_s2, [#allocation5], %s698_s12, %s698_s12, %s699_s13  }
 0x111   :  { %695 = dma.done.wait [#allocation5], 1024  }
 0x112   :  { %696 = vsyncadd [#allocation5], 4294966272 }
 0x113   :  { %448 = vsyncpa [#allocation4], 1 }
 0x114   :  { %449 = vsyncpa [#allocation7], 1 }
 0x115   :  { %450 = vsyncpa [#allocation5], 1 }

</bundles_post_ra>
